<compile_context>
chip_gen: v6e
topology: v6e:2x2x1
jax: 0.10.0
libtpu: 0.0.40
codegen_flags: <defaults>
</compile_context>

<pallas_src>
import jax
import jax.numpy as jnp
import numpy as np
from jax.experimental import pallas as pl
from jax.experimental.pallas import tpu as pltpu

LANES = 128


# ----------------------------------------------------------------------------
# One-time parameter preparation: fold conv weights + BN (scale AND geometry:
# width zero-pad, stride, 3x3 taps) into two packed, lane-padded buffers.
# ----------------------------------------------------------------------------
def _prepare_packed_operands(all_params, N, H, W, strides=(2, 3, 3, 2)):
    n_layers = len(all_params)
    w_pack = np.zeros((2 * n_layers, LANES, LANES), np.float32)
    b_pack = np.zeros((2 * n_layers, LANES), np.float32)
    geom = []
    Hi, Wi = H, W
    for li, (params, s) in enumerate(zip(all_params, strides)):
        w_dw, dw_scale, dw_bias, w_pw, pw_scale, pw_bias = (
            np.asarray(p, np.float32) for p in params)
        C = w_dw.shape[0]                       # depthwise weights: (C, 1, 3, 3)
        Cout = w_pw.shape[0]                    # pointwise weights: (Cout, C, 1, 1)
        Ho = (Hi - 1) // s + 1                  # ksize=3, pad=1
        Wo = (Wi - 1) // s + 1
        CW, CWo, CoWo = C * Wi, C * Wo, Cout * Wo
        assert CW <= LANES and 3 * CWo <= LANES and CoWo <= LANES

        # Wcol (slot 2l): depthwise column selection with dw weights * BN scale
        # folded in; the 3 kh taps are concatenated along the output columns.
        # Width zero-padding = skipped (zero) taps.
        for kh in range(3):
            for c in range(C):
                for wo in range(Wo):
                    for kw in range(3):
                        wi = s * wo + kw - 1
                        if 0 <= wi < Wi:
                            w_pack[2 * li, c * Wi + wi,
                                   kh * CWo + c * Wo + wo] += (
                                       w_dw[c, 0, kh, kw] * dw_scale[c])

        # Wmix (slot 2l+1): pointwise channel-mixing matrix, pw BN scale folded.
        wmix = np.kron((w_pw[:, :, 0, 0] * pw_scale[:, None]).T,
                       np.eye(Wo, dtype=np.float32))
        w_pack[2 * li + 1, :CWo, :CoWo] = wmix

        # Folded-BN biases (scale already folded into the weights above).
        b_pack[2 * li, :CWo] = np.repeat(dw_bias, Wo)
        b_pack[2 * li + 1, :CoWo] = np.repeat(pw_bias, Wo)

        # Per-sample row pitch of this layer's depthwise staging buffer:
        # >= Hi + 2 (top + bottom zero-pad rows) and a multiple of s so the
        # per-kh row selection is a single stride-s sublane load.
        P = -(-(Hi + 2) // s) * s
        geom.append(dict(s=s, Hi=Hi, Wi=Wi, C=C, Cout=Cout, Ho=Ho, Wo=Wo,
                         CW=CW, CWo=CWo, CoWo=CoWo, P=P))
        Hi, Wi = Ho, Wo
    return w_pack, b_pack, geom


# ----------------------------------------------------------------------------
# Fused kernel: all 4 DWConv blocks, single gridless invocation.
# ----------------------------------------------------------------------------
def _make_net_dw_kernel(geom, N):
    n_layers = len(geom)
    H0, CW0 = geom[0]["Hi"], geom[0]["CW"]

    def kernel(x_ref, w_ref, b_ref, out_ref, tmp_ref):
        zrow = jnp.zeros((1, LANES), jnp.float32)

        def store_padded(src, src_pitch, h_rows, pitch):
            # Lay `h_rows` data rows per sample into tmp_ref with a zero pad
            # row on top and zero tail rows, at a per-sample pitch of `pitch`.
            tail = pitch - h_rows - 1
            for n in range(N):
                base = n * pitch
                tmp_ref[base:base + 1, :] = zrow
                tmp_ref[base + 1:base + 1 + h_rows, :] = (
                    src[n * src_pitch:n * src_pitch + h_rows, :])
                if tail > 0:
                    tmp_ref[base + 1 + h_rows:base + pitch, :] = (
                        jnp.zeros((tail, LANES), jnp.float32))

        # ---- layer-1 front: depthwise column matmul straight off the input.
        b0 = jnp.dot(x_ref[...], w_ref[0, 0:CW0, :],
                     preferred_element_type=jnp.float32)            # (N*H0, 128)
        store_padded(b0, H0, H0, geom[0]["P"])

        for li, g in enumerate(geom):
            s, Ho, CWo, P = g["s"], g["Ho"], g["CWo"], g["P"]
            ps = P // s
            m = (N - 1) * ps + Ho        # rows pulled per kh tap (incl. junk gaps)

            # Depthwise row selection + kh accumulation: three stride-s sublane
            # loads replace the 0/1 R_kh matmuls (pure data movement off the MXU).
            acc = None
            for kh in range(3):
                sel = tmp_ref[pl.ds(kh, m, stride=s), :]             # (m, 128)
                blk = sel[:, kh * CWo:(kh + 1) * CWo]                # (m, CWo)
                acc = blk if acc is None else acc + blk

            # Folded-BN bias + ReLU, then pointwise 1x1 conv (+ BN bias + ReLU).
            dw = jnp.maximum(acc + b_ref[2 * li:2 * li + 1, 0:CWo], 0.0)
            pw = jnp.dot(dw, w_ref[2 * li + 1, 0:CWo, :],
                         preferred_element_type=jnp.float32)         # (m, 128)
            act = jnp.maximum(pw + b_ref[2 * li + 1:2 * li + 2, :], 0.0)

            if li + 1 < n_layers:
                # Fuse the NEXT layer's depthwise column matmul here, then
                # re-lay the valid rows (zero pad rows) into the staging buffer.
                nxt = jnp.dot(act, w_ref[2 * (li + 1), :, :],
                              preferred_element_type=jnp.float32)    # (m, 128)
                store_padded(nxt, ps, Ho, geom[li + 1]["P"])
            else:
                for n in range(N):
                    out_ref[n * Ho:(n + 1) * Ho, :] = act[n * ps:n * ps + Ho, :]

    return kernel


def make_net_dw_forward(all_params, N, H, W):
    """Returns (jitted forward fn taking (x, w_pack, b_pack), (w_pack, b_pack))."""
    C0 = np.asarray(all_params[0][0]).shape[0]
    assert C0 == 1, "wrapper assumes a single input channel (free NCHW reshape)"
    w_pack, b_pack, geom = _prepare_packed_operands(all_params, N, H, W)
    kernel = _make_net_dw_kernel(geom, N)

    gf = geom[-1]
    Ho_f, Wo_f, Cout_f = gf["Ho"], gf["Wo"], gf["Cout"]
    tmp_rows = -(-(N * geom[0]["P"]) // 8) * 8
    out_shape = jax.ShapeDtypeStruct((N * Ho_f, LANES), jnp.float32)

    # Advisory cost estimate for XLA's scheduler (8 tiny MXU dots total).
    flops = 2 * (N * H) * geom[0]["CW"] * LANES
    for li, g in enumerate(geom):
        m = (N - 1) * (g["P"] // g["s"]) + g["Ho"]
        flops += 2 * m * g["CWo"] * LANES
        if li + 1 < len(geom):
            flops += 2 * m * LANES * LANES
    bytes_accessed = 4 * (N * H * W + w_pack.size + b_pack.size
                          + N * Ho_f * LANES)
    cost = pl.CostEstimate(flops=flops, transcendentals=0,
                           bytes_accessed=bytes_accessed)

    vmem = pl.BlockSpec(memory_space=pltpu.MemorySpace.VMEM)
    call = pl.pallas_call(
        kernel,
        out_shape=out_shape,
        in_specs=[vmem, vmem, vmem],
        out_specs=vmem,
        scratch_shapes=[pltpu.VMEM((tmp_rows, LANES), jnp.float32)],
        cost_estimate=cost,
    )

    w_pack = jnp.asarray(w_pack)
    b_pack = jnp.asarray(b_pack)

    @jax.jit
    def forward(x, w, b):
        n = x.shape[0]
        x2d = x.reshape(n * H, W)                # free reshape (C0 == 1, NCHW)
        out = call(x2d, w, b)                    # (N*Ho_f, 128), lane-dense
        out = out.reshape(n, Ho_f, LANES)[:, :, :Cout_f * Wo_f]
        return out.reshape(n, Ho_f, Cout_f, Wo_f).transpose(0, 2, 1, 3)

    return forward, (w_pack, b_pack)


# ----------------------------------------------------------------------------
# Deterministic synthetic parameters (shapes from Net_DW.__init__), BN folded.
# ----------------------------------------------------------------------------
def make_dwconv_params(key, cin, cout):
    ks = jax.random.split(key, 10)
    eps = 1e-3
    w_dw = 0.5 * jax.random.normal(ks[0], (cin, 1, 3, 3), jnp.float32)
    dw_gamma = 1.0 + 0.1 * jax.random.normal(ks[1], (cin,), jnp.float32)
    dw_beta = 0.1 * jax.random.normal(ks[2], (cin,), jnp.float32)
    dw_mean = 0.1 * jax.random.normal(ks[3], (cin,), jnp.float32)
    dw_var = jax.random.uniform(ks[4], (cin,), jnp.float32, 0.5, 1.5)
    w_pw = 0.5 * jax.random.normal(ks[5], (cout, cin, 1, 1), jnp.float32)
    pw_gamma = 1.0 + 0.1 * jax.random.normal(ks[6], (cout,), jnp.float32)
    pw_beta = 0.1 * jax.random.normal(ks[7], (cout,), jnp.float32)
    pw_mean = 0.1 * jax.random.normal(ks[8], (cout,), jnp.float32)
    pw_var = jax.random.uniform(ks[9], (cout,), jnp.float32, 0.5, 1.5)

    dw_scale = dw_gamma / jnp.sqrt(dw_var + eps)
    dw_bias = dw_beta - dw_mean * dw_scale
    pw_scale = pw_gamma / jnp.sqrt(pw_var + eps)
    pw_bias = pw_beta - pw_mean * pw_scale
    return (w_dw, dw_scale, dw_bias, w_pw, pw_scale, pw_bias)


# ----------------------------------------------------------------------------
# Pure-JAX reference (for numerical self-check)
# ----------------------------------------------------------------------------
def dwconv_block_ref(x, params, stride):
    w_dw, dw_scale, dw_bias, w_pw, pw_scale, pw_bias = params
    cin = x.shape[1]
    y = jax.lax.conv_general_dilated(
        x, w_dw, (stride, stride), ((1, 1), (1, 1)),
        feature_group_count=cin,
        dimension_numbers=('NCHW', 'OIHW', 'NCHW'))
    y = jnp.maximum(y * dw_scale[None, :, None, None]
                    + dw_bias[None, :, None, None], 0.0)
    z = jax.lax.conv_general_dilated(
        y, w_pw, (1, 1), ((0, 0), (0, 0)),
        dimension_numbers=('NCHW', 'OIHW', 'NCHW'))
    z = jnp.maximum(z * pw_scale[None, :, None, None]
                    + pw_bias[None, :, None, None], 0.0)
    return z


def net_dw_ref(x, all_params):
    strides = (2, 3, 3, 2)
    for params, s in zip(all_params, strides):
        x = dwconv_block_ref(x, params, s)
    return x


# ----------------------------------------------------------------------------
if __name__ == "__main__":
    key = jax.random.PRNGKey(0)
    kx, k1, k2, k3, k4 = jax.random.split(key, 5)

    # Net_DW: 1->6 (s=2), 6->6 (s=3), 6->6 (s=3), 6->10 (s=2)
    all_params = [
        make_dwconv_params(k1, 1, 6),
        make_dwconv_params(k2, 6, 6),
        make_dwconv_params(k3, 6, 6),
        make_dwconv_params(k4, 6, 10),
    ]

    # Small NCHW input: (batch=2, C=1, 36, 36) -> output (2, 10, 1, 1)
    N, H, W = 2, 36, 36
    x = jax.random.normal(kx, (N, 1, H, W), jnp.float32)

    forward, (w_pack, b_pack) = make_net_dw_forward(all_params, N, H, W)

    out = jax.block_until_ready(forward(x, w_pack, b_pack))
    ref = jax.block_until_ready(net_dw_ref(x, all_params))

    assert out.shape == (2, 10, 1, 1), out.shape
    np.testing.assert_allclose(np.asarray(out), np.asarray(ref),
                               rtol=2e-3, atol=2e-3)
    print("KERNEL_OK")
</pallas_src>

<mosaic_0001>
module attributes {stable_mosaic.version = 11 : i64} {
  func.func @kernel(%arg0: memref<72x36xf32, #tpu.memory_space<vmem>>, %arg1: memref<8x128x128xf32, #tpu.memory_space<vmem>>, %arg2: memref<8x128xf32, #tpu.memory_space<vmem>>, %arg3: memref<2x128xf32, #tpu.memory_space<vmem>>, %arg4: memref<80x128xf32, #tpu.memory_space<vmem>>) attributes {dimension_semantics = [], scalar_prefetch = 0 : i64, scratch_operands = 1 : i64, tpu.core_type = #tpu.core_type<tc>} {
    %cst = arith.constant 0.000000e+00 : f32
    %0 = vector.broadcast %cst : f32 to vector<1x128xf32>
    %c0 = arith.constant 0 : index
    %c0_0 = arith.constant 0 : index
    %1 = vector.load %arg0[%c0, %c0_0] : memref<72x36xf32, #tpu.memory_space<vmem>>, vector<72x36xf32>
    %c0_1 = arith.constant 0 : index
    %c0_2 = arith.constant 0 : index
    %c0_3 = arith.constant 0 : index
    %2 = vector.load %arg1[%c0_1, %c0_2, %c0_3] : memref<8x128x128xf32, #tpu.memory_space<vmem>>, vector<1x36x128xf32>
    %3 = vector.shape_cast %2 : vector<1x36x128xf32> to vector<36x128xf32>
    %cst_4 = arith.constant dense<0.000000e+00> : vector<72x128xf32>
    %4 = tpu.matmul %1, %3, %cst_4 {dimension_numbers = #tpu.dot_dimension_numbers<[1], [0], [0], [1], [0, 0, 1, 1], [], []>} : vector<72x36xf32>, vector<36x128xf32>, vector<72x128xf32> -> vector<72x128xf32>
    %c0_5 = arith.constant 0 : index
    %c0_6 = arith.constant 0 : index
    %5 = vector.load %arg4[%c0_5, %c0_6] : memref<80x128xf32, #tpu.memory_space<vmem>>, vector<1x128xf32>
    tpu.vector_store %arg4[%c0_5, %c0_6], %0 {strides = array<i32>} : memref<80x128xf32, #tpu.memory_space<vmem>>, vector<1x128xf32>,
    %6 = vector.extract_strided_slice %4 {offsets = [0, 0], sizes = [36, 128], strides = [1, 1]} : vector<72x128xf32> to vector<36x128xf32>
    %c1 = arith.constant 1 : index
    %c0_7 = arith.constant 0 : index
    %7 = vector.load %arg4[%c1, %c0_7] : memref<80x128xf32, #tpu.memory_space<vmem>>, vector<36x128xf32>
    tpu.vector_store %arg4[%c1, %c0_7], %6 {strides = array<i32>} : memref<80x128xf32, #tpu.memory_space<vmem>>, vector<36x128xf32>,
    %cst_8 = arith.constant 0.000000e+00 : f32
    %8 = vector.broadcast %cst_8 : f32 to vector<1x128xf32>
    %c37 = arith.constant 37 : index
    %c0_9 = arith.constant 0 : index
    %9 = vector.load %arg4[%c37, %c0_9] : memref<80x128xf32, #tpu.memory_space<vmem>>, vector<1x128xf32>
    tpu.vector_store %arg4[%c37, %c0_9], %8 {strides = array<i32>} : memref<80x128xf32, #tpu.memory_space<vmem>>, vector<1x128xf32>,
    %c38 = arith.constant 38 : index
    %c0_10 = arith.constant 0 : index
    %10 = vector.load %arg4[%c38, %c0_10] : memref<80x128xf32, #tpu.memory_space<vmem>>, vector<1x128xf32>
    tpu.vector_store %arg4[%c38, %c0_10], %0 {strides = array<i32>} : memref<80x128xf32, #tpu.memory_space<vmem>>, vector<1x128xf32>,
    %11 = vector.extract_strided_slice %4 {offsets = [36, 0], sizes = [36, 128], strides = [1, 1]} : vector<72x128xf32> to vector<36x128xf32>
    %c39 = arith.constant 39 : index
    %c0_11 = arith.constant 0 : index
    %12 = vector.load %arg4[%c39, %c0_11] : memref<80x128xf32, #tpu.memory_space<vmem>>, vector<36x128xf32>
    tpu.vector_store %arg4[%c39, %c0_11], %11 {strides = array<i32>} : memref<80x128xf32, #tpu.memory_space<vmem>>, vector<36x128xf32>,
    %cst_12 = arith.constant 0.000000e+00 : f32
    %13 = vector.broadcast %cst_12 : f32 to vector<1x128xf32>
    %c75 = arith.constant 75 : index
    %c0_13 = arith.constant 0 : index
    %14 = vector.load %arg4[%c75, %c0_13] : memref<80x128xf32, #tpu.memory_space<vmem>>, vector<1x128xf32>
    tpu.vector_store %arg4[%c75, %c0_13], %13 {strides = array<i32>} : memref<80x128xf32, #tpu.memory_space<vmem>>, vector<1x128xf32>,
    %c0_14 = arith.constant 0 : index
    %c0_15 = arith.constant 0 : index
    %15 = tpu.strided_load %arg4[%c0_14, %c0_15] {strides = array<i32: 2, 1>} : memref<80x128xf32, #tpu.memory_space<vmem>>, vector<37x128xf32>
    %16 = vector.extract_strided_slice %15 {offsets = [0, 0], sizes = [37, 18], strides = [1, 1]} : vector<37x128xf32> to vector<37x18xf32>
    %c1_16 = arith.constant 1 : index
    %c0_17 = arith.constant 0 : index
    %17 = tpu.strided_load %arg4[%c1_16, %c0_17] {strides = array<i32: 2, 1>} : memref<80x128xf32, #tpu.memory_space<vmem>>, vector<37x128xf32>
    %18 = vector.extract_strided_slice %17 {offsets = [0, 18], sizes = [37, 18], strides = [1, 1]} : vector<37x128xf32> to vector<37x18xf32>
    %19 = arith.addf %16, %18 : vector<37x18xf32>
    %c2 = arith.constant 2 : index
    %c0_18 = arith.constant 0 : index
    %20 = tpu.strided_load %arg4[%c2, %c0_18] {strides = array<i32: 2, 1>} : memref<80x128xf32, #tpu.memory_space<vmem>>, vector<37x128xf32>
    %21 = vector.extract_strided_slice %20 {offsets = [0, 36], sizes = [37, 18], strides = [1, 1]} : vector<37x128xf32> to vector<37x18xf32>
    %22 = arith.addf %19, %21 : vector<37x18xf32>
    %c0_19 = arith.constant 0 : index
    %c0_20 = arith.constant 0 : index
    %23 = vector.load %arg2[%c0_19, %c0_20] : memref<8x128xf32, #tpu.memory_space<vmem>>, vector<1x18xf32>
    %24 = vector.broadcast %23 : vector<1x18xf32> to vector<37x18xf32>
    %25 = arith.addf %22, %24 : vector<37x18xf32>
    %cst_21 = arith.constant 0.000000e+00 : f32
    %26 = vector.broadcast %cst_21 : f32 to vector<37x18xf32>
    %27 = arith.maximumf %25, %26 : vector<37x18xf32>
    %c1_22 = arith.constant 1 : index
    %c0_23 = arith.constant 0 : index
    %c0_24 = arith.constant 0 : index
    %28 = vector.load %arg1[%c1_22, %c0_23, %c0_24] : memref<8x128x128xf32, #tpu.memory_space<vmem>>, vector<1x18x128xf32>
    %29 = vector.shape_cast %28 : vector<1x18x128xf32> to vector<18x128xf32>
    %cst_25 = arith.constant dense<0.000000e+00> : vector<37x128xf32>
    %30 = tpu.matmul %27, %29, %cst_25 {dimension_numbers = #tpu.dot_dimension_numbers<[1], [0], [0], [1], [0, 0, 1, 1], [], []>} : vector<37x18xf32>, vector<18x128xf32>, vector<37x128xf32> -> vector<37x128xf32>
    %c1_26 = arith.constant 1 : index
    %c0_27 = arith.constant 0 : index
    %31 = vector.load %arg2[%c1_26, %c0_27] : memref<8x128xf32, #tpu.memory_space<vmem>>, vector<1x128xf32>
    %32 = vector.broadcast %31 : vector<1x128xf32> to vector<37x128xf32>
    %33 = arith.addf %30, %32 : vector<37x128xf32>
    %cst_28 = arith.constant 0.000000e+00 : f32
    %34 = vector.broadcast %cst_28 : f32 to vector<37x128xf32>
    %35 = arith.maximumf %33, %34 : vector<37x128xf32>
    %c2_29 = arith.constant 2 : index
    %c0_30 = arith.constant 0 : index
    %c0_31 = arith.constant 0 : index
    %36 = vector.load %arg1[%c2_29, %c0_30, %c0_31] : memref<8x128x128xf32, #tpu.memory_space<vmem>>, vector<1x128x128xf32>
    %37 = vector.shape_cast %36 : vector<1x128x128xf32> to vector<128x128xf32>
    %cst_32 = arith.constant dense<0.000000e+00> : vector<37x128xf32>
    %38 = tpu.matmul %35, %37, %cst_32 {dimension_numbers = #tpu.dot_dimension_numbers<[1], [0], [0], [1], [0, 0, 1, 1], [], []>} : vector<37x128xf32>, vector<128x128xf32>, vector<37x128xf32> -> vector<37x128xf32>
    %c0_33 = arith.constant 0 : index
    %c0_34 = arith.constant 0 : index
    %39 = vector.load %arg4[%c0_33, %c0_34] : memref<80x128xf32, #tpu.memory_space<vmem>>, vector<1x128xf32>
    tpu.vector_store %arg4[%c0_33, %c0_34], %0 {strides = array<i32>} : memref<80x128xf32, #tpu.memory_space<vmem>>, vector<1x128xf32>,
    %40 = vector.extract_strided_slice %38 {offsets = [0, 0], sizes = [18, 128], strides = [1, 1]} : vector<37x128xf32> to vector<18x128xf32>
    %c1_35 = arith.constant 1 : index
    %c0_36 = arith.constant 0 : index
    %41 = vector.load %arg4[%c1_35, %c0_36] : memref<80x128xf32, #tpu.memory_space<vmem>>, vector<18x128xf32>
    tpu.vector_store %arg4[%c1_35, %c0_36], %40 {strides = array<i32>} : memref<80x128xf32, #tpu.memory_space<vmem>>, vector<18x128xf32>,
    %cst_37 = arith.constant 0.000000e+00 : f32
    %42 = vector.broadcast %cst_37 : f32 to vector<2x128xf32>
    %c19 = arith.constant 19 : index
    %c0_38 = arith.constant 0 : index
    %43 = vector.load %arg4[%c19, %c0_38] : memref<80x128xf32, #tpu.memory_space<vmem>>, vector<2x128xf32>
    tpu.vector_store %arg4[%c19, %c0_38], %42 {strides = array<i32>} : memref<80x128xf32, #tpu.memory_space<vmem>>, vector<2x128xf32>,
    %c21 = arith.constant 21 : index
    %c0_39 = arith.constant 0 : index
    %44 = vector.load %arg4[%c21, %c0_39] : memref<80x128xf32, #tpu.memory_space<vmem>>, vector<1x128xf32>
    tpu.vector_store %arg4[%c21, %c0_39], %0 {strides = array<i32>} : memref<80x128xf32, #tpu.memory_space<vmem>>, vector<1x128xf32>,
    %45 = vector.extract_strided_slice %38 {offsets = [19, 0], sizes = [18, 128], strides = [1, 1]} : vector<37x128xf32> to vector<18x128xf32>
    %c22 = arith.constant 22 : index
    %c0_40 = arith.constant 0 : index
    %46 = vector.load %arg4[%c22, %c0_40] : memref<80x128xf32, #tpu.memory_space<vmem>>, vector<18x128xf32>
    tpu.vector_store %arg4[%c22, %c0_40], %45 {strides = array<i32>} : memref<80x128xf32, #tpu.memory_space<vmem>>, vector<18x128xf32>,
    %cst_41 = arith.constant 0.000000e+00 : f32
    %47 = vector.broadcast %cst_41 : f32 to vector<2x128xf32>
    %c40 = arith.constant 40 : index
    %c0_42 = arith.constant 0 : index
    %48 = vector.load %arg4[%c40, %c0_42] : memref<80x128xf32, #tpu.memory_space<vmem>>, vector<2x128xf32>
    tpu.vector_store %arg4[%c40, %c0_42], %47 {strides = array<i32>} : memref<80x128xf32, #tpu.memory_space<vmem>>, vector<2x128xf32>,
    %c0_43 = arith.constant 0 : index
    %c0_44 = arith.constant 0 : index
    %49 = tpu.strided_load %arg4[%c0_43, %c0_44] {strides = array<i32: 3, 1>} : memref<80x128xf32, #tpu.memory_space<vmem>>, vector<13x128xf32>
    %50 = vector.extract_strided_slice %49 {offsets = [0, 0], sizes = [13, 36], strides = [1, 1]} : vector<13x128xf32> to vector<13x36xf32>
    %c1_45 = arith.constant 1 : index
    %c0_46 = arith.constant 0 : index
    %51 = tpu.strided_load %arg4[%c1_45, %c0_46] {strides = array<i32: 3, 1>} : memref<80x128xf32, #tpu.memory_space<vmem>>, vector<13x128xf32>
    %52 = vector.extract_strided_slice %51 {offsets = [0, 36], sizes = [13, 36], strides = [1, 1]} : vector<13x128xf32> to vector<13x36xf32>
    %53 = arith.addf %50, %52 : vector<13x36xf32>
    %c2_47 = arith.constant 2 : index
    %c0_48 = arith.constant 0 : index
    %54 = tpu.strided_load %arg4[%c2_47, %c0_48] {strides = array<i32: 3, 1>} : memref<80x128xf32, #tpu.memory_space<vmem>>, vector<13x128xf32>
    %55 = vector.extract_strided_slice %54 {offsets = [0, 72], sizes = [13, 36], strides = [1, 1]} : vector<13x128xf32> to vector<13x36xf32>
    %56 = arith.addf %53, %55 : vector<13x36xf32>
    %c2_49 = arith.constant 2 : index
    %c0_50 = arith.constant 0 : index
    %57 = vector.load %arg2[%c2_49, %c0_50] : memref<8x128xf32, #tpu.memory_space<vmem>>, vector<1x36xf32>
    %58 = vector.broadcast %57 : vector<1x36xf32> to vector<13x36xf32>
    %59 = arith.addf %56, %58 : vector<13x36xf32>
    %cst_51 = arith.constant 0.000000e+00 : f32
    %60 = vector.broadcast %cst_51 : f32 to vector<13x36xf32>
    %61 = arith.maximumf %59, %60 : vector<13x36xf32>
    %c3 = arith.constant 3 : index
    %c0_52 = arith.constant 0 : index
    %c0_53 = arith.constant 0 : index
    %62 = vector.load %arg1[%c3, %c0_52, %c0_53] : memref<8x128x128xf32, #tpu.memory_space<vmem>>, vector<1x36x128xf32>
    %63 = vector.shape_cast %62 : vector<1x36x128xf32> to vector<36x128xf32>
    %cst_54 = arith.constant dense<0.000000e+00> : vector<13x128xf32>
    %64 = tpu.matmul %61, %63, %cst_54 {dimension_numbers = #tpu.dot_dimension_numbers<[1], [0], [0], [1], [0, 0, 1, 1], [], []>} : vector<13x36xf32>, vector<36x128xf32>, vector<13x128xf32> -> vector<13x128xf32>
    %c3_55 = arith.constant 3 : index
    %c0_56 = arith.constant 0 : index
    %65 = vector.load %arg2[%c3_55, %c0_56] : memref<8x128xf32, #tpu.memory_space<vmem>>, vector<1x128xf32>
    %66 = vector.broadcast %65 : vector<1x128xf32> to vector<13x128xf32>
    %67 = arith.addf %64, %66 : vector<13x128xf32>
    %cst_57 = arith.constant 0.000000e+00 : f32
    %68 = vector.broadcast %cst_57 : f32 to vector<13x128xf32>
    %69 = arith.maximumf %67, %68 : vector<13x128xf32>
    %c4 = arith.constant 4 : index
    %c0_58 = arith.constant 0 : index
    %c0_59 = arith.constant 0 : index
    %70 = vector.load %arg1[%c4, %c0_58, %c0_59] : memref<8x128x128xf32, #tpu.memory_space<vmem>>, vector<1x128x128xf32>
    %71 = vector.shape_cast %70 : vector<1x128x128xf32> to vector<128x128xf32>
    %cst_60 = arith.constant dense<0.000000e+00> : vector<13x128xf32>
    %72 = tpu.matmul %69, %71, %cst_60 {dimension_numbers = #tpu.dot_dimension_numbers<[1], [0], [0], [1], [0, 0, 1, 1], [], []>} : vector<13x128xf32>, vector<128x128xf32>, vector<13x128xf32> -> vector<13x128xf32>
    %c0_61 = arith.constant 0 : index
    %c0_62 = arith.constant 0 : index
    %73 = vector.load %arg4[%c0_61, %c0_62] : memref<80x128xf32, #tpu.memory_space<vmem>>, vector<1x128xf32>
    tpu.vector_store %arg4[%c0_61, %c0_62], %0 {strides = array<i32>} : memref<80x128xf32, #tpu.memory_space<vmem>>, vector<1x128xf32>,
    %74 = vector.extract_strided_slice %72 {offsets = [0, 0], sizes = [6, 128], strides = [1, 1]} : vector<13x128xf32> to vector<6x128xf32>
    %c1_63 = arith.constant 1 : index
    %c0_64 = arith.constant 0 : index
    %75 = vector.load %arg4[%c1_63, %c0_64] : memref<80x128xf32, #tpu.memory_space<vmem>>, vector<6x128xf32>
    tpu.vector_store %arg4[%c1_63, %c0_64], %74 {strides = array<i32>} : memref<80x128xf32, #tpu.memory_space<vmem>>, vector<6x128xf32>,
    %cst_65 = arith.constant 0.000000e+00 : f32
    %76 = vector.broadcast %cst_65 : f32 to vector<2x128xf32>
    %c7 = arith.constant 7 : index
    %c0_66 = arith.constant 0 : index
    %77 = vector.load %arg4[%c7, %c0_66] : memref<80x128xf32, #tpu.memory_space<vmem>>, vector<2x128xf32>
    tpu.vector_store %arg4[%c7, %c0_66], %76 {strides = array<i32>} : memref<80x128xf32, #tpu.memory_space<vmem>>, vector<2x128xf32>,
    %c9 = arith.constant 9 : index
    %c0_67 = arith.constant 0 : index
    %78 = vector.load %arg4[%c9, %c0_67] : memref<80x128xf32, #tpu.memory_space<vmem>>, vector<1x128xf32>
    tpu.vector_store %arg4[%c9, %c0_67], %0 {strides = array<i32>} : memref<80x128xf32, #tpu.memory_space<vmem>>, vector<1x128xf32>,
    %79 = vector.extract_strided_slice %72 {offsets = [7, 0], sizes = [6, 128], strides = [1, 1]} : vector<13x128xf32> to vector<6x128xf32>
    %c10 = arith.constant 10 : index
    %c0_68 = arith.constant 0 : index
    %80 = vector.load %arg4[%c10, %c0_68] : memref<80x128xf32, #tpu.memory_space<vmem>>, vector<6x128xf32>
    tpu.vector_store %arg4[%c10, %c0_68], %79 {strides = array<i32>} : memref<80x128xf32, #tpu.memory_space<vmem>>, vector<6x128xf32>,
    %cst_69 = arith.constant 0.000000e+00 : f32
    %81 = vector.broadcast %cst_69 : f32 to vector<2x128xf32>
    %c16 = arith.constant 16 : index
    %c0_70 = arith.constant 0 : index
    %82 = vector.load %arg4[%c16, %c0_70] : memref<80x128xf32, #tpu.memory_space<vmem>>, vector<2x128xf32>
    tpu.vector_store %arg4[%c16, %c0_70], %81 {strides = array<i32>} : memref<80x128xf32, #tpu.memory_space<vmem>>, vector<2x128xf32>,
    %c0_71 = arith.constant 0 : index
    %c0_72 = arith.constant 0 : index
    %83 = tpu.strided_load %arg4[%c0_71, %c0_72] {strides = array<i32: 3, 1>} : memref<80x128xf32, #tpu.memory_space<vmem>>, vector<5x128xf32>
    %84 = vector.extract_strided_slice %83 {offsets = [0, 0], sizes = [5, 12], strides = [1, 1]} : vector<5x128xf32> to vector<5x12xf32>
    %c1_73 = arith.constant 1 : index
    %c0_74 = arith.constant 0 : index
    %85 = tpu.strided_load %arg4[%c1_73, %c0_74] {strides = array<i32: 3, 1>} : memref<80x128xf32, #tpu.memory_space<vmem>>, vector<5x128xf32>
    %86 = vector.extract_strided_slice %85 {offsets = [0, 12], sizes = [5, 12], strides = [1, 1]} : vector<5x128xf32> to vector<5x12xf32>
    %87 = arith.addf %84, %86 : vector<5x12xf32>
    %c2_75 = arith.constant 2 : index
    %c0_76 = arith.constant 0 : index
    %88 = tpu.strided_load %arg4[%c2_75, %c0_76] {strides = array<i32: 3, 1>} : memref<80x128xf32, #tpu.memory_space<vmem>>, vector<5x128xf32>
    %89 = vector.extract_strided_slice %88 {offsets = [0, 24], sizes = [5, 12], strides = [1, 1]} : vector<5x128xf32> to vector<5x12xf32>
    %90 = arith.addf %87, %89 : vector<5x12xf32>
    %c4_77 = arith.constant 4 : index
    %c0_78 = arith.constant 0 : index
    %91 = vector.load %arg2[%c4_77, %c0_78] : memref<8x128xf32, #tpu.memory_space<vmem>>, vector<1x12xf32>
    %92 = vector.broadcast %91 : vector<1x12xf32> to vector<5x12xf32>
    %93 = arith.addf %90, %92 : vector<5x12xf32>
    %cst_79 = arith.constant 0.000000e+00 : f32
    %94 = vector.broadcast %cst_79 : f32 to vector<5x12xf32>
    %95 = arith.maximumf %93, %94 : vector<5x12xf32>
    %c5 = arith.constant 5 : index
    %c0_80 = arith.constant 0 : index
    %c0_81 = arith.constant 0 : index
    %96 = vector.load %arg1[%c5, %c0_80, %c0_81] : memref<8x128x128xf32, #tpu.memory_space<vmem>>, vector<1x12x128xf32>
    %97 = vector.shape_cast %96 : vector<1x12x128xf32> to vector<12x128xf32>
    %cst_82 = arith.constant dense<0.000000e+00> : vector<5x128xf32>
    %98 = tpu.matmul %95, %97, %cst_82 {dimension_numbers = #tpu.dot_dimension_numbers<[1], [0], [0], [1], [0, 0, 1, 1], [], []>} : vector<5x12xf32>, vector<12x128xf32>, vector<5x128xf32> -> vector<5x128xf32>
    %c5_83 = arith.constant 5 : index
    %c0_84 = arith.constant 0 : index
    %99 = vector.load %arg2[%c5_83, %c0_84] : memref<8x128xf32, #tpu.memory_space<vmem>>, vector<1x128xf32>
    %100 = vector.broadcast %99 : vector<1x128xf32> to vector<5x128xf32>
    %101 = arith.addf %98, %100 : vector<5x128xf32>
    %cst_85 = arith.constant 0.000000e+00 : f32
    %102 = vector.broadcast %cst_85 : f32 to vector<5x128xf32>
    %103 = arith.maximumf %101, %102 : vector<5x128xf32>
    %c6 = arith.constant 6 : index
    %c0_86 = arith.constant 0 : index
    %c0_87 = arith.constant 0 : index
    %104 = vector.load %arg1[%c6, %c0_86, %c0_87] : memref<8x128x128xf32, #tpu.memory_space<vmem>>, vector<1x128x128xf32>
    %105 = vector.shape_cast %104 : vector<1x128x128xf32> to vector<128x128xf32>
    %cst_88 = arith.constant dense<0.000000e+00> : vector<5x128xf32>
    %106 = tpu.matmul %103, %105, %cst_88 {dimension_numbers = #tpu.dot_dimension_numbers<[1], [0], [0], [1], [0, 0, 1, 1], [], []>} : vector<5x128xf32>, vector<128x128xf32>, vector<5x128xf32> -> vector<5x128xf32>
    %c0_89 = arith.constant 0 : index
    %c0_90 = arith.constant 0 : index
    %107 = vector.load %arg4[%c0_89, %c0_90] : memref<80x128xf32, #tpu.memory_space<vmem>>, vector<1x128xf32>
    tpu.vector_store %arg4[%c0_89, %c0_90], %0 {strides = array<i32>} : memref<80x128xf32, #tpu.memory_space<vmem>>, vector<1x128xf32>,
    %108 = vector.extract_strided_slice %106 {offsets = [0, 0], sizes = [2, 128], strides = [1, 1]} : vector<5x128xf32> to vector<2x128xf32>
    %c1_91 = arith.constant 1 : index
    %c0_92 = arith.constant 0 : index
    %109 = vector.load %arg4[%c1_91, %c0_92] : memref<80x128xf32, #tpu.memory_space<vmem>>, vector<2x128xf32>
    tpu.vector_store %arg4[%c1_91, %c0_92], %108 {strides = array<i32>} : memref<80x128xf32, #tpu.memory_space<vmem>>, vector<2x128xf32>,
    %cst_93 = arith.constant 0.000000e+00 : f32
    %110 = vector.broadcast %cst_93 : f32 to vector<1x128xf32>
    %c3_94 = arith.constant 3 : index
    %c0_95 = arith.constant 0 : index
    %111 = vector.load %arg4[%c3_94, %c0_95] : memref<80x128xf32, #tpu.memory_space<vmem>>, vector<1x128xf32>
    tpu.vector_store %arg4[%c3_94, %c0_95], %110 {strides = array<i32>} : memref<80x128xf32, #tpu.memory_space<vmem>>, vector<1x128xf32>,
    %c4_96 = arith.constant 4 : index
    %c0_97 = arith.constant 0 : index
    %112 = vector.load %arg4[%c4_96, %c0_97] : memref<80x128xf32, #tpu.memory_space<vmem>>, vector<1x128xf32>
    tpu.vector_store %arg4[%c4_96, %c0_97], %0 {strides = array<i32>} : memref<80x128xf32, #tpu.memory_space<vmem>>, vector<1x128xf32>,
    %113 = vector.extract_strided_slice %106 {offsets = [3, 0], sizes = [2, 128], strides = [1, 1]} : vector<5x128xf32> to vector<2x128xf32>
    %c5_98 = arith.constant 5 : index
    %c0_99 = arith.constant 0 : index
    %114 = vector.load %arg4[%c5_98, %c0_99] : memref<80x128xf32, #tpu.memory_space<vmem>>, vector<2x128xf32>
    tpu.vector_store %arg4[%c5_98, %c0_99], %113 {strides = array<i32>} : memref<80x128xf32, #tpu.memory_space<vmem>>, vector<2x128xf32>,
    %cst_100 = arith.constant 0.000000e+00 : f32
    %115 = vector.broadcast %cst_100 : f32 to vector<1x128xf32>
    %c7_101 = arith.constant 7 : index
    %c0_102 = arith.constant 0 : index
    %116 = vector.load %arg4[%c7_101, %c0_102] : memref<80x128xf32, #tpu.memory_space<vmem>>, vector<1x128xf32>
    tpu.vector_store %arg4[%c7_101, %c0_102], %115 {strides = array<i32>} : memref<80x128xf32, #tpu.memory_space<vmem>>, vector<1x128xf32>,
    %c0_103 = arith.constant 0 : index
    %c0_104 = arith.constant 0 : index
    %117 = tpu.strided_load %arg4[%c0_103, %c0_104] {strides = array<i32: 2, 1>} : memref<80x128xf32, #tpu.memory_space<vmem>>, vector<3x128xf32>
    %118 = vector.extract_strided_slice %117 {offsets = [0, 0], sizes = [3, 6], strides = [1, 1]} : vector<3x128xf32> to vector<3x6xf32>
    %c1_105 = arith.constant 1 : index
    %c0_106 = arith.constant 0 : index
    %119 = tpu.strided_load %arg4[%c1_105, %c0_106] {strides = array<i32: 2, 1>} : memref<80x128xf32, #tpu.memory_space<vmem>>, vector<3x128xf32>
    %120 = vector.extract_strided_slice %119 {offsets = [0, 6], sizes = [3, 6], strides = [1, 1]} : vector<3x128xf32> to vector<3x6xf32>
    %121 = arith.addf %118, %120 : vector<3x6xf32>
    %c2_107 = arith.constant 2 : index
    %c0_108 = arith.constant 0 : index
    %122 = tpu.strided_load %arg4[%c2_107, %c0_108] {strides = array<i32: 2, 1>} : memref<80x128xf32, #tpu.memory_space<vmem>>, vector<3x128xf32>
    %123 = vector.extract_strided_slice %122 {offsets = [0, 12], sizes = [3, 6], strides = [1, 1]} : vector<3x128xf32> to vector<3x6xf32>
    %124 = arith.addf %121, %123 : vector<3x6xf32>
    %c6_109 = arith.constant 6 : index
    %c0_110 = arith.constant 0 : index
    %125 = vector.load %arg2[%c6_109, %c0_110] : memref<8x128xf32, #tpu.memory_space<vmem>>, vector<1x6xf32>
    %126 = vector.broadcast %125 : vector<1x6xf32> to vector<3x6xf32>
    %127 = arith.addf %124, %126 : vector<3x6xf32>
    %cst_111 = arith.constant 0.000000e+00 : f32
    %128 = vector.broadcast %cst_111 : f32 to vector<3x6xf32>
    %129 = arith.maximumf %127, %128 : vector<3x6xf32>
    %c7_112 = arith.constant 7 : index
    %c0_113 = arith.constant 0 : index
    %c0_114 = arith.constant 0 : index
    %130 = vector.load %arg1[%c7_112, %c0_113, %c0_114] : memref<8x128x128xf32, #tpu.memory_space<vmem>>, vector<1x6x128xf32>
    %131 = vector.shape_cast %130 : vector<1x6x128xf32> to vector<6x128xf32>
    %cst_115 = arith.constant dense<0.000000e+00> : vector<3x128xf32>
    %132 = tpu.matmul %129, %131, %cst_115 {dimension_numbers = #tpu.dot_dimension_numbers<[1], [0], [0], [1], [0, 0, 1, 1], [], []>} : vector<3x6xf32>, vector<6x128xf32>, vector<3x128xf32> -> vector<3x128xf32>
    %c7_116 = arith.constant 7 : index
    %c0_117 = arith.constant 0 : index
    %133 = vector.load %arg2[%c7_116, %c0_117] : memref<8x128xf32, #tpu.memory_space<vmem>>, vector<1x128xf32>
    %134 = vector.broadcast %133 : vector<1x128xf32> to vector<3x128xf32>
    %135 = arith.addf %132, %134 : vector<3x128xf32>
    %cst_118 = arith.constant 0.000000e+00 : f32
    %136 = vector.broadcast %cst_118 : f32 to vector<3x128xf32>
    %137 = arith.maximumf %135, %136 : vector<3x128xf32>
    %138 = vector.extract_strided_slice %137 {offsets = [0, 0], sizes = [1, 128], strides = [1, 1]} : vector<3x128xf32> to vector<1x128xf32>
    %c0_119 = arith.constant 0 : index
    %c0_120 = arith.constant 0 : index
    %139 = vector.load %arg3[%c0_119, %c0_120] : memref<2x128xf32, #tpu.memory_space<vmem>>, vector<1x128xf32>
    tpu.vector_store %arg3[%c0_119, %c0_120], %138 {strides = array<i32>} : memref<2x128xf32, #tpu.memory_space<vmem>>, vector<1x128xf32>,
    %140 = vector.extract_strided_slice %137 {offsets = [2, 0], sizes = [1, 128], strides = [1, 1]} : vector<3x128xf32> to vector<1x128xf32>
    %c1_121 = arith.constant 1 : index
    %c0_122 = arith.constant 0 : index
    %141 = vector.load %arg3[%c1_121, %c0_122] : memref<2x128xf32, #tpu.memory_space<vmem>>, vector<1x128xf32>
    tpu.vector_store %arg3[%c1_121, %c0_122], %140 {strides = array<i32>} : memref<2x128xf32, #tpu.memory_space<vmem>>, vector<1x128xf32>,
    return
  }
}

</mosaic_0001>

<bundles_post_ra>
// kernel: forward.1
= control target key start
LH: loop header
LB: loop body
LE: loop exit
PB: predicated region body
PF: predicated region fallthrough
CT: control target
= control target key end

     0   :  { %8 = vsyncpa [#allocation4], 0  ;;  %s1726_s0 = inlined_call_operand.hbm [shape: f32[72,36], index: 0, kind: input, shape index: {}]   ;;  %s1727_s1 = inlined_call_operand.hbm [shape: f32[8,128,128], index: 1, kind: input, shape index: {}]   ;;  %s1728_s2 = inlined_call_operand.hbm [shape: f32[8,128], index: 2, kind: input, shape index: {}]   ;;  %s1729_s3 = inlined_call_operand.hbm [shape: f32[2,128], index: 3, kind: output, shape index: {}]  }
   0x1   :  { %9 = vsyncpa [#allocation7], 0 }
   0x2   :  { %10 = vsyncpa [#allocation5], 0  ;;  %s1537_s12 = smov [#allocation6]   ;;  %s1538_s14 = smov [#allocation3]  }
   0x3   :  { %s28_s13 = sshll.u32 %s1537_s12, 4  ;;  %s16_s15 = sshll.u32 %s1538_s14, 4  ;;  %s29_s13 = int_to_ptr.vmem [resolvable:$true] %s28_s13  ;;  %s17_s15 = int_to_ptr.vmem [resolvable:$true] %s16_s15 }
   0x4   :  { %s1459_s16 = scalar_lea.vmem %s29_s13, 16384  ;;  %p1464_p1 = scmp.lt.s32.totalorder %s29_s13, %s29_s13 }
   0x5   :  { %p1460_p0 = scmp.ne.s32.totalorder %s29_s13, %s1459_s16  ;;  %p1465_p2 = scmp.lt.s32.totalorder %s1459_s16, %s1459_s16 }
   0x7   :  { %p1466_p3 = por %p1465_p2, %p1464_p1 }
   0x9   :  { %p1467_p4 = pnand %p1466_p3, %p1460_p0 }
   0xb   :  { %1470 = shalt.err (!%p1467_p4)
}
   0xc   :  { %s1539_s17 = smov 128   ;;  %s1540_s18 = smov 8  }
   0xd   :  { %34 = dma.hbm_to_vmem [thread:$0]  %s1727_s1, 16384, %s29_s13, [#allocation7], %s1539_s17, %s1539_s17, %s1540_s18  }
   0xe   :  { %s1479_s21 = scalar_lea.vmem %s17_s15, 1152  ;;  %p1484_p6 = scmp.lt.s32.totalorder %s17_s15, %s17_s15 }
   0xf   :  { %p1480_p5 = scmp.ne.s32.totalorder %s17_s15, %s1479_s21  ;;  %p1485_p7 = scmp.lt.s32.totalorder %s1479_s21, %s1479_s21 }
  0x11   :  { %p1486_p8 = por %p1485_p7, %p1484_p6 }
  0x13   :  { %p1487_p9 = pnand %p1486_p8, %p1480_p5 }
  0x15   :  { %1490 = shalt.err (!%p1487_p9)
}
  0x16   :  { %22 = dma.hbm_to_vmem [thread:$0]  %s1726_s0, 1152, %s17_s15, [#allocation4], %s1539_s17, %s1539_s17, %s1540_s18  }
  0x17   :  { %s1541_s24 = smov [#allocation8]  }
  0x18   :  { %s41_s25 = sshll.u32 %s1541_s24, 4  ;;  %s42_s25 = int_to_ptr.vmem [resolvable:$true] %s41_s25 }
  0x19   :  { %s1499_s26 = scalar_lea.vmem %s42_s25, 128  ;;  %p1504_p11 = scmp.lt.s32.totalorder %s42_s25, %s42_s25 }
  0x1a   :  { %p1500_p10 = scmp.ne.s32.totalorder %s42_s25, %s1499_s26  ;;  %p1505_p12 = scmp.lt.s32.totalorder %s1499_s26, %s1499_s26 }
  0x1c   :  { %p1506_p13 = por %p1505_p12, %p1504_p11 }
  0x1e   :  { %p1507_p0 = pnand %p1506_p13, %p1500_p10 }
  0x20   :  { %1510 = shalt.err (!%p1507_p0)
}
  0x21   :  { %44 = dma.hbm_to_vmem [thread:$0]  %s1728_s2, 128, %s42_s25, [#allocation7]  }
  0x22   :  { %1531 = dma.done.wait [#allocation4], 1152  }
  0x23   :  { %1532 = vsyncadd [#allocation4], 4294966144 }
  0x24   :  { %1533 = dma.done.wait [#allocation7], 16512  }
  0x25   :  { %1534 = vsyncadd [#allocation7], 4294950784  ;;  %v1542_v0 = vmov 0.0   ;;  %vm1543_vm0 = vmmov 0   ;;  %vm96_vm1 = vcmask 1043456   ;;  %v66_v2 = vld [vmem:[#allocation6 + $0x18] sm:$0xff] }
  0x26   :  { %210 = vst [vmem:[#allocation2] sm:$0x1] %v1542_v0  ;;  %216 = vst [vmem:[#allocation2 + $0x25] sm:$0x1] %v1542_v0  ;;  %1237 = vmatprep.subr.mxu0 %v1542_v0  ;;  %1247 = vmatprep.mubr.msk.f32.mxu0 %vm1543_vm0, %v1542_v0  ;;  %v67_v1 = vld [vmem:[#allocation6 + $0x20] sm:$0xf] }
  0x27   :  { %217 = vst [vmem:[#allocation2 + $0x26] sm:$0x1] %v1542_v0  ;;  %1274 = vmatprep.subr.mxu1 %v1542_v0  ;;  %1280 = vmatprep.mubr.msk.f32.mxu1 %vm1543_vm0, %v1542_v0  ;;  %v65_v3 = vld [vmem:[#allocation6 + $0x10] sm:$0xff]  ;;  %v64_v4 = vld [vmem:[#allocation6 + $0x8] sm:$0xff]  ;;  %v63_v5 = vld [vmem:[#allocation6] sm:$0xff]  ;;  %vm68_vm2 = vcmask 293888  }
  0x28   :  { %1238 = vmatpush3.msk.msra.mxu0 %vm96_vm1, %v67_v1  ;;  %v54_v6 = vld [vmem:[#allocation3] sm:$0xff]  ;;  %v55_v7 = vld [vmem:[#allocation3 + $0x8] sm:$0xff]  ;;  %v56_v8 = vld [vmem:[#allocation3 + $0x10] sm:$0xff]  ;;  %vm343_vm3 = vcmask 1041408   ;;  %s1544_s0 = smov 110   ;;  %s1545_s2 = smov 92  }
  0x29   :  { %1239 = vmatprep.subr.mxu0 %v1542_v0  ;;  %v57_v9 = vld [vmem:[#allocation3 + $0x18] sm:$0xff]  ;;  %v58_v10 = vld [vmem:[#allocation3 + $0x20] sm:$0xff]  ;;  %v59_v11 = vld [vmem:[#allocation3 + $0x28] sm:$0xff]  ;;  %vm327_vm4 = vcmask 146432   ;;  %s1546_s28 = smov 56   ;;  %s1547_s29 = smov 104  }
  0x2a   :  { %1240 = vmatpush3.msra.mxu0 %v66_v2  ;;  %v60_v12 = vld [vmem:[#allocation3 + $0x30] sm:$0xff]  ;;  %v61_v13 = vld [vmem:[#allocation3 + $0x38] sm:$0xff]  ;;  %v62_v14 = vld [vmem:[#allocation3 + $0x40] sm:$0xff]  ;;  %s1548_s30 = smov 116   ;;  %vm821_vm5 = vcmask 97280   ;;  %vm1023_vm6 = vcmask 1045504  }
  0x2b   :  { %1241 = vmatprep.subr.mxu0 %v1542_v0  ;;  %v321_v18 = vld [vmem:[#allocation6 + $0x90] sm:$0x3]  ;;  %v320_v20 = vld [vmem:[#allocation6 + $0x88] sm:$0xff]  ;;  %v319_v22 = vld [vmem:[#allocation6 + $0x80] sm:$0xff]  ;;  %s1549_s4 = smov 122   ;;  %vm1019_vm7 = vcmask 48128  }
  0x2c   :  { %1242 = vmatpush3.msra.mxu0 %v65_v3  ;;  %1275 = vmatpush3.msk.msra.mxu1 %vm343_vm3, %v321_v18  ;;  %v1636_v51 = vld [vmem:[#allocation8] ss:$0 sm:$0xff]  ;;  %v458_v57 = vld [vmem:[#allocation6 + $0x178] sm:$0xff]  ;;  %v457_v59 = vld [vmem:[#allocation6 + $0x170] sm:$0xff]  ;;  %s1550_s5 = smov [#allocation9]  }
  0x2d   :  { %1243 = vmatprep.subr.mxu0 %v1542_v0  ;;  %1276 = vmatprep.subr.mxu1 %v1542_v0  ;;  %v456_v62 = vld [vmem:[#allocation6 + $0x168] sm:$0xff]  ;;  %v455_v1 = vld [vmem:[#allocation6 + $0x160] sm:$0xff]  ;;  %s1106_s6 = sshll.u32 %s1550_s5, 4  ;;  %s1107_s6 = int_to_ptr.vmem [resolvable:$true] %s1106_s6 }
  0x2e   :  { %1244 = vmatpush3.msra.mxu0 %v64_v4  ;;  %1277 = vmatpush3.msra.mxu1 %v320_v20  ;;  %s1511_s7 = scalar_lea.vmem %s1107_s6, 32  ;;  %p1516_p2 = scmp.lt.s32.totalorder %s1107_s6, %s1107_s6 }
  0x2f   :  { %1245 = vmatprep.subr.mxu0 %v1542_v0  ;;  %1278 = vmatprep.subr.mxu1 %v1542_v0  ;;  %p1512_p1 = scmp.ne.s32.totalorder %s1107_s6, %s1511_s7  ;;  %p1517_p3 = scmp.lt.s32.totalorder %s1511_s7, %s1511_s7 }
  0x30   :  { %1246 = vmatpush3.msra.mxu0 %v63_v5  ;;  %1279 = vmatpush3.msra.mxu1 %v319_v22  ;;  %v454_v5 = vld [vmem:[#allocation6 + $0x158] sm:$0xff] }
  0x31   :  { %1248 = vmatmul.mubr.msk.f32.vlgmr.msra.gmra.mxu0 %vm68_vm2, %v54_v6  ;;  %1295 = vmatprep.subr.mxu1 %v1542_v0  ;;  %p1518_p4 = por %p1517_p3, %p1516_p2 }
  0x32   :  { %1250 = vmatprep.mubr.msk.f32.mxu0 %vm1543_vm0, %v1542_v0 }
  0x33   :  { %p1519_p5 = pnand %p1518_p4, %p1512_p1 }
  0x35   :  { %1251 = vmatmul.mubr.msk.f32.gmra.mxu0 %vm68_vm2, %v55_v7 }
  0x36   :  { %1253 = vmatprep.mubr.msk.f32.mxu0 %vm1543_vm0, %v1542_v0 }
  0x39   :  { %1254 = vmatmul.mubr.msk.f32.gmra.mxu0 %vm68_vm2, %v56_v8  ;;  %v453_v8 = vld [vmem:[#allocation6 + $0x150] sm:$0xff] }
  0x3a   :  { %1256 = vmatprep.mubr.msk.f32.mxu0 %vm1543_vm0, %v1542_v0 }
  0x3d   :  { %1257 = vmatmul.mubr.msk.f32.gmra.mxu0 %vm68_vm2, %v57_v9 }
  0x3e   :  { %1259 = vmatprep.mubr.msk.f32.mxu0 %vm1543_vm0, %v1542_v0 }
  0x41   :  { %1260 = vmatmul.mubr.msk.f32.gmra.mxu0 %vm68_vm2, %v58_v10  ;;  %v452_v10 = vld [vmem:[#allocation6 + $0x148] sm:$0xff] }
  0x42   :  { %1262 = vmatprep.mubr.msk.f32.mxu0 %vm1543_vm0, %v1542_v0 }
  0x45   :  { %1263 = vmatmul.mubr.msk.f32.gmra.mxu0 %vm68_vm2, %v59_v11 }
  0x46   :  { %1265 = vmatprep.mubr.msk.f32.mxu0 %vm1543_vm0, %v1542_v0 }
  0x49   :  { %1266 = vmatmul.mubr.msk.f32.gmra.mxu0 %vm68_vm2, %v60_v12  ;;  %v451_v12 = vld [vmem:[#allocation6 + $0x140] sm:$0xff] }
  0x4a   :  { %1268 = vmatprep.mubr.msk.f32.mxu0 %vm1543_vm0, %v1542_v0 }
  0x4d   :  { %1269 = vmatmul.mubr.msk.f32.gmra.mxu0 %vm68_vm2, %v61_v13 }
  0x4e   :  { %1271 = vmatprep.mubr.msk.f32.mxu0 %vm1543_vm0, %v1542_v0 }
  0x51   :  { %1272 = vmatmul.mubr.msk.f32.gmra.mxu0 %vm68_vm2, %v62_v14 }
  0xf1   :  { %v166_v15 = vpop.f32.mrf.mxu0 }
  0xf2   :  { %211 = vst [vmem:[#allocation2 + $0x1] sm:$0xff] %v166_v15 }
  0xf3   :  { %v1249_v16 = vpop.f32.mrf.mxu0 }
  0xf5   :  { %v171_v17 = vpop.f32.mrf.mxu0 }
  0xf6   :  { %212 = vst [vmem:[#allocation2 + $0x9] sm:$0xff] %v171_v17  ;;  %v450_v17 = vld [vmem:[#allocation6 + $0x138] sm:$0xff] }
  0xf7   :  { %v1252_v19 = vpop.f32.mrf.mxu0 }
  0xf8   :  { %v449_v19 = vld [vmem:[#allocation6 + $0x130] sm:$0xff] }
  0xf9   :  { %v176_v21 = vpop.f32.mrf.mxu0 }
  0xfa   :  { %213 = vst [vmem:[#allocation2 + $0x11] sm:$0xff] %v176_v21 }
  0xfb   :  { %v1255_v23 = vpop.f32.mrf.mxu0 }
  0xfd   :  { %v224_v24 = vld [vmem:[#allocation2] ss:$2 sm:$0xff]  ;;  %v181_v25 = vpop.f32.mrf.mxu0  ;;  %v234_v26 = vld [vmem:[#allocation2 + $0x1] ss:$2 sm:$0xff] }
  0xfe   :  { %549 = vst [vmem:[#allocation2] sm:$0x1] %v1542_v0  ;;  %214 = vst [vmem:[#allocation2 + $0x19] sm:$0xff] %v181_v25  ;;  %248 = vrot.lane.b32.xlu0 %v234_v26, %s1544_s0  ;;  %v269_v29 = vld [vmem:[#allocation2 + $0x2] ss:$2 sm:$0xff] }
  0xff   :  { %v1258_v27 = vpop.f32.mrf.mxu0 }
 0x101   :  { %v186_v28 = vpop.f32.mrf.mxu0 }
 0x102   :  { %215 = vst [vmem:[#allocation2 + $0x21] sm:$0xf] %v186_v28  ;;  %218 = vst [vmem:[#allocation2 + $0x23] sm:$0xf0] %v186_v28  ;;  %283 = vrot.lane.b32.xlu0 %v269_v29, %s1545_s2  ;;  %v447_v28 = vld [vmem:[#allocation6 + $0x120] sm:$0xff] }
 0x103   :  { %v1261_v30 = vpop.f32.mrf.mxu0 }
 0x104   :  { %v446_v30 = vld [vmem:[#allocation6 + $0x118] sm:$0xff] }
 0x105   :  { %v191_v31 = vpop.f32.mrf.mxu0  ;;  %v236_v32 = vld [vmem:[#allocation2 + $0x11] ss:$2 sm:$0xff]  ;;  %v271_v33 = vld [vmem:[#allocation2 + $0x12] ss:$2 sm:$0xff] }
 0x106   :  { %v226_v34 = vld [vmem:[#allocation2 + $0x10] ss:$2 sm:$0xff]  ;;  %219 = vst [vmem:[#allocation2 + $0x2b] sm:$0xff] %v191_v31  ;;  %250 = vrot.lane.b32.xlu1 %v236_v32, %s1544_s0  ;;  %554 = vst [vmem:[#allocation2 + $0x15] sm:$0x1] %v1542_v0  ;;  %v445_v32 = vld [vmem:[#allocation6 + $0x110] sm:$0xff] }
 0x107   :  { %553 = vst [vmem:[#allocation2 + $0x13] sm:$0x3] %v1542_v0  ;;  %v1264_v35 = vpop.f32.mrf.mxu0 }
 0x108   :  { %v1127_v35 = vld [vmem:[#allocation8 + $0x1] ss:$0 sm:$0xff] }
 0x109   :  { %v196_v36 = vpop.f32.mrf.mxu0 }
 0x10a   :  { %220 = vst [vmem:[#allocation2 + $0x33] sm:$0xff] %v196_v36  ;;  %285 = vrot.lane.b32.xlu1 %v271_v33, %s1545_s2  ;;  %v444_v33 = vld [vmem:[#allocation6 + $0x108] sm:$0xff] }
 0x10b   :  { %v1267_v37 = vpop.f32.mrf.mxu0 }
 0x10d   :  { %v201_v38 = vpop.f32.mrf.mxu0  ;;  %v273_v39 = vld [vmem:[#allocation2 + $0x22] ss:$2 sm:$0xff]  ;;  %v238_v40 = vld [vmem:[#allocation2 + $0x21] ss:$2 sm:$0xff] }
 0x10e   :  { %v228_v41 = vld [vmem:[#allocation2 + $0x20] ss:$2 sm:$0xff]  ;;  %221 = vst [vmem:[#allocation2 + $0x3b] sm:$0xff] %v201_v38  ;;  %287 = vrot.lane.b32.xlu1 %v273_v39, %s1545_s2  ;;  %252 = vrot.lane.b32.xlu0 %v238_v40, %s1544_s0 }
 0x10f   :  { %558 = vst [vmem:[#allocation2 + $0x28] sm:$0x3] %v1542_v0  ;;  %v1270_v42 = vpop.f32.mrf.mxu0 }
 0x111   :  { %v206_v43 = vpop.f32.mrf.mxu0 }
 0x112   :  { %222 = vst [vmem:[#allocation2 + $0x43] sm:$0xff] %v206_v43 }
 0x113   :  { %v1273_v44 = vpop.f32.mrf.mxu0 }
 0x115   :  { %v275_v45 = vld [vmem:[#allocation2 + $0x32] ss:$2 sm:$0xff]  ;;  %v240_v46 = vld [vmem:[#allocation2 + $0x31] ss:$2 sm:$0xff] }
 0x116   :  { %289 = vrot.lane.b32.xlu1 %v275_v45, %s1545_s2  ;;  %254 = vrot.lane.b32.xlu0 %v240_v46, %s1544_s0  ;;  %v230_v15 = vld [vmem:[#allocation2 + $0x30] ss:$2 sm:$0xff] }
 0x119   :  { %v277_v47 = vld [vmem:[#allocation2 + $0x42] ss:$2 sm:$0x1f]  ;;  %v242_v48 = vld [vmem:[#allocation2 + $0x41] ss:$2 sm:$0x1f] }
 0x11a   :  { %291 = vrot.lane.b32.xlu1 %v277_v47, %s1545_s2  ;;  %256 = vrot.lane.b32.xlu0 %v242_v48, %s1544_s0  ;;  %v232_v21 = vld [vmem:[#allocation2 + $0x40] ss:$2 sm:$0x1f] }
 0x170   :  { %v249_v49 = vpop.permute.xlu0 %248 }
 0x171   :  { %v263_v50 = vadd.f32 %v249_v49, %v224_v24  ;;  %v448_v24 = vld [vmem:[#allocation6 + $0x128] sm:$0xff] }
 0x174   :  { %v284_v52 = vpop.permute.xlu0 %283 }
 0x175   :  { %v298_v53 = vadd.f32 %v284_v52, %v263_v50 }
 0x177   :  { %v308_v54 = vadd.f32 %v1636_v51, %v298_v53 }
 0x178   :  { %v251_v55 = vpop.permute.xlu1 %250 }
 0x179   :  { %v313_v56 = vmax.f32 %v308_v54, 0.0  ;;  %v264_v58 = vadd.f32 %v251_v55, %v226_v34  ;;  %v443_v34 = vld [vmem:[#allocation6 + $0x100] sm:$0xff] }
 0x17b   :  { %1281 = vmatmul.mubr.msk.f32.vlgmr.msra.gmra.mxu1 %vm327_vm4, %v313_v56  ;;  %v602_v56 = vld [vmem:[#allocation6 + $0x1a0] sm:$0xf] }
 0x17c   :  { %v286_v60 = vpop.permute.xlu1 %285  ;;  %1283 = vmatprep.mubr.msk.f32.mxu1 %vm1543_vm0, %v1542_v0  ;;  %1296 = vmatpush3.msra.mxu1 %v458_v57  ;;  %v601_v57 = vld [vmem:[#allocation6 + $0x198] sm:$0xff] }
 0x17d   :  { %v299_v61 = vadd.f32 %v286_v60, %v264_v58  ;;  %1297 = vmatprep.subr.mxu1 %v1542_v0  ;;  %1342 = vmatprep.subr.msk.mxu0 %vm96_vm1, %v602_v56 }
 0x17e   :  { %1298 = vmatpush3.msra.mxu1 %v457_v59  ;;  %1343 = vmatpush3.msk.msra.mxu0 %vm96_vm1, %v602_v56  ;;  %v913_v56 = vld [vmem:[#allocation6 + $0x368] sm:$0xff] }
 0x17f   :  { %v309_v63 = vadd.f32 %v1636_v51, %v299_v61  ;;  %1299 = vmatprep.subr.mxu1 %v1542_v0  ;;  %1344 = vmatprep.subr.mxu0 %v601_v57 }
 0x180   :  { %v253_v2 = vpop.permute.xlu0 %252  ;;  %1300 = vmatpush3.msra.mxu1 %v456_v62  ;;  %v288_v6 = vpop.permute.xlu1 %287  ;;  %1345 = vmatpush3.msra.mxu0 %v601_v57  ;;  %v600_v62 = vld [vmem:[#allocation6 + $0x190] sm:$0xff] }
 0x181   :  { %v314_v3 = vmax.f32 %v309_v63, 0.0  ;;  %v265_v4 = vadd.f32 %v253_v2, %v228_v41  ;;  %1301 = vmatprep.subr.mxu1 %v1542_v0  ;;  %1346 = vmatprep.subr.mxu0 %v600_v62  ;;  %v599_v2 = vld [vmem:[#allocation6 + $0x188] sm:$0xff] }
 0x182   :  { %1302 = vmatpush3.msra.mxu1 %v455_v1  ;;  %1347 = vmatpush3.msra.mxu0 %v600_v62  ;;  %v910_v62 = vld [vmem:[#allocation6 + $0x350] sm:$0xff] }
 0x183   :  { %v300_v7 = vadd.f32 %v288_v6, %v265_v4  ;;  %1284 = vmatmul.mubr.msk.f32.gmra.mxu1 %vm327_vm4, %v314_v3  ;;  %1303 = vmatprep.subr.mxu1 %v1542_v0 }
 0x184   :  { %1286 = vmatprep.mubr.msk.f32.mxu1 %vm1543_vm0, %v1542_v0  ;;  %1304 = vmatpush3.msra.mxu1 %v454_v5 }
 0x185   :  { %v310_v9 = vadd.f32 %v1636_v51, %v300_v7  ;;  %1305 = vmatprep.subr.mxu1 %v1542_v0  ;;  %1348 = vmatprep.subr.mxu0 %v599_v2  ;;  %v598_v7 = vld [vmem:[#allocation6 + $0x180] sm:$0xff] }
 0x186   :  { %1306 = vmatpush3.msra.mxu1 %v453_v8  ;;  %1349 = vmatpush3.msra.mxu0 %v599_v2  ;;  %v907_v2 = vld [vmem:[#allocation6 + $0x338] sm:$0xff] }
 0x187   :  { %v315_v11 = vmax.f32 %v310_v9, 0.0  ;;  %1307 = vmatprep.subr.mxu1 %v1542_v0  ;;  %1350 = vmatprep.subr.mxu0 %v598_v7 }
 0x188   :  { %v290_v13 = vpop.permute.xlu1 %289  ;;  %v255_v14 = vpop.permute.xlu0 %254  ;;  %1308 = vmatpush3.msra.mxu1 %v452_v10  ;;  %1351 = vmatpush3.msra.mxu0 %v598_v7 }
 0x189   :  { %v266_v16 = vadd.f32 %v255_v14, %v230_v15  ;;  %1287 = vmatmul.mubr.msk.f32.gmra.mxu1 %vm327_vm4, %v315_v11  ;;  %1309 = vmatprep.subr.mxu1 %v1542_v0  ;;  %v710_v11 = vld [vmem:[#allocation6 + $0x278] sm:$0xff]  ;;  %v708_v14 = vld [vmem:[#allocation6 + $0x268] sm:$0xff]  ;;  %v707_v15 = vld [vmem:[#allocation6 + $0x260] sm:$0xff] }
 0x18a   :  { %1289 = vmatprep.mubr.msk.f32.mxu1 %vm1543_vm0, %v1542_v0  ;;  %1310 = vmatpush3.msra.mxu1 %v451_v12  ;;  %v709_v12 = vld [vmem:[#allocation6 + $0x270] sm:$0xff] }
 0x18b   :  { %v301_v18 = vadd.f32 %v290_v13, %v266_v16  ;;  %1311 = vmatprep.subr.mxu1 %v1542_v0  ;;  %1397 = vmatprep.subr.mxu0 %v1542_v0 }
 0x18c   :  { %v257_v20 = vpop.permute.xlu0 %256  ;;  %1312 = vmatpush3.msra.mxu1 %v450_v17  ;;  %v292_v25 = vpop.permute.xlu1 %291  ;;  %v706_v17 = vld [vmem:[#allocation6 + $0x258] sm:$0xff] }
 0x18d   :  { %v311_v22 = vadd.f32 %v1636_v51, %v301_v18  ;;  %v267_v23 = vadd.f32 %v257_v20, %v232_v21  ;;  %1313 = vmatprep.subr.mxu1 %v1542_v0  ;;  %v705_v18 = vld [vmem:[#allocation6 + $0x250] sm:$0xff]  ;;  %v703_v20 = vld [vmem:[#allocation6 + $0x240] sm:$0xff]  ;;  %v702_v21 = vld [vmem:[#allocation6 + $0x238] sm:$0xff] }
 0x18e   :  { %1314 = vmatpush3.msra.mxu1 %v449_v19  ;;  %v704_v19 = vld [vmem:[#allocation6 + $0x248] sm:$0xff] }
 0x18f   :  { %v316_v26 = vmax.f32 %v311_v22, 0.0  ;;  %v302_v27 = vadd.f32 %v292_v25, %v267_v23  ;;  %1315 = vmatprep.subr.mxu1 %v1542_v0  ;;  %v701_v22 = vld [vmem:[#allocation6 + $0x230] sm:$0xff]  ;;  %v700_v23 = vld [vmem:[#allocation6 + $0x228] sm:$0xff] }
 0x190   :  { %1316 = vmatpush3.msra.mxu1 %v448_v24  ;;  %v699_v24 = vld [vmem:[#allocation6 + $0x220] sm:$0xff] }
 0x191   :  { %v312_v29 = vadd.f32 %v1636_v51, %v302_v27  ;;  %1290 = vmatmul.mubr.msk.f32.gmra.mxu1 %vm327_vm4, %v316_v26  ;;  %1317 = vmatprep.subr.mxu1 %v1542_v0  ;;  %v1134_v27 = vld [vmem:[#allocation8 + $0x2] ss:$0 sm:$0xff] }
 0x192   :  { %1292 = vmatprep.mubr.msk.f32.mxu1 %vm1543_vm0, %v1542_v0  ;;  %1318 = vmatpush3.msra.mxu1 %v447_v28 }
 0x193   :  { %v317_v31 = vmax.f32 %v312_v29, 0.0  ;;  %1319 = vmatprep.subr.mxu1 %v1542_v0 }
 0x194   :  { %1320 = vmatpush3.msra.mxu1 %v446_v30 }
 0x195   :  { %1293 = vmatmul.mubr.msk.f32.gmra.mxu1 %vm327_vm4, %v317_v31  ;;  %1321 = vmatprep.subr.mxu1 %v1542_v0 }
 0x196   :  { %1327 = vmatprep.mubr.msk.f32.mxu1 %vm1543_vm0, %v1542_v0  ;;  %1322 = vmatpush3.msra.mxu1 %v445_v32 }
 0x197   :  { %1323 = vmatprep.subr.mxu1 %v1542_v0 }
 0x198   :  { %1324 = vmatpush3.msra.mxu1 %v444_v33 }
 0x199   :  { %1325 = vmatprep.subr.mxu1 %v1542_v0 }
 0x19a   :  { %1326 = vmatpush3.msra.mxu1 %v443_v34 }
 0x19b   :  { %1355 = vmatprep.subr.mxu1 %v710_v11 }
 0x23b   :  { %v413_v36 = vpop.f32.mrf.mxu1 }
 0x23c   :  { %v414_v37 = vadd.f32 %v1127_v35, %v413_v36 }
 0x23d   :  { %v1282_v38 = vpop.f32.mrf.mxu1 }
 0x23e   :  { %v437_v39 = vmax.f32 %v414_v37, 0.0 }
 0x240   :  { %1328 = vmatmul.mubr.f32.vlgmr.msra.gmra.mxu1 %v437_v39  ;;  %v698_v39 = vld [vmem:[#allocation6 + $0x218] sm:$0xff] }
 0x241   :  { %1330 = vmatprep.mubr.msk.f32.mxu1 %vm1543_vm0, %v1542_v0  ;;  %1356 = vmatpush3.msra.mxu1 %v710_v11 }
 0x242   :  { %1357 = vmatprep.subr.mxu1 %v709_v12 }
 0x243   :  { %v418_v40 = vpop.f32.mrf.mxu1  ;;  %1358 = vmatpush3.msra.mxu1 %v709_v12 }
 0x244   :  { %v419_v41 = vadd.f32 %v1127_v35, %v418_v40  ;;  %1359 = vmatprep.subr.mxu1 %v708_v14  ;;  %v697_v40 = vld [vmem:[#allocation6 + $0x210] sm:$0xff] }
 0x245   :  { %v1285_v42 = vpop.f32.mrf.mxu1  ;;  %1360 = vmatpush3.msra.mxu1 %v708_v14  ;;  %v902_v14 = vld [vmem:[#allocation6 + $0x310] sm:$0xff] }
 0x246   :  { %v438_v43 = vmax.f32 %v419_v41, 0.0  ;;  %1361 = vmatprep.subr.mxu1 %v707_v15  ;;  %v696_v41 = vld [vmem:[#allocation6 + $0x208] sm:$0xff]  ;;  %v695_v42 = vld [vmem:[#allocation6 + $0x200] sm:$0xff] }
 0x247   :  { %1362 = vmatpush3.msra.mxu1 %v707_v15  ;;  %v901_v15 = vld [vmem:[#allocation6 + $0x308] sm:$0xff] }
 0x248   :  { %1331 = vmatmul.mubr.f32.gmra.mxu1 %v438_v43  ;;  %1363 = vmatprep.subr.mxu1 %v706_v17  ;;  %v1135_v43 = vld [vmem:[#allocation8 + $0x3] ss:$0 sm:$0xff] }
 0x249   :  { %v423_v44 = vpop.f32.mrf.mxu1  ;;  %1333 = vmatprep.mubr.msk.f32.mxu1 %vm1543_vm0, %v1542_v0  ;;  %1364 = vmatpush3.msra.mxu1 %v706_v17  ;;  %v1140_v17 = vld [vmem:[#allocation8 + $0x5] ss:$0 sm:$0xff] }
 0x24a   :  { %v424_v45 = vadd.f32 %v1127_v35, %v423_v44  ;;  %1365 = vmatprep.subr.mxu1 %v705_v18 }
 0x24b   :  { %v1288_v46 = vpop.f32.mrf.mxu1  ;;  %1366 = vmatpush3.msra.mxu1 %v705_v18 }
 0x24c   :  { %v439_v47 = vmax.f32 %v424_v45, 0.0  ;;  %1367 = vmatprep.subr.mxu1 %v704_v19 }
 0x24d   :  { %1368 = vmatpush3.msra.mxu1 %v704_v19 }
 0x24e   :  { %1334 = vmatmul.mubr.f32.gmra.mxu1 %v439_v47  ;;  %1369 = vmatprep.subr.mxu1 %v703_v20 }
 0x24f   :  { %1336 = vmatprep.mubr.msk.f32.mxu1 %vm1543_vm0, %v1542_v0  ;;  %1370 = vmatpush3.msra.mxu1 %v703_v20 }
 0x250   :  { %1371 = vmatprep.subr.mxu1 %v702_v21 }
 0x251   :  { %v428_v48 = vpop.f32.mrf.mxu1  ;;  %1372 = vmatpush3.msra.mxu1 %v702_v21 }
 0x252   :  { %v429_v49 = vadd.f32 %v1127_v35, %v428_v48  ;;  %1373 = vmatprep.subr.mxu1 %v701_v22 }
 0x253   :  { %v1291_v50 = vpop.f32.mrf.mxu1  ;;  %1374 = vmatpush3.msra.mxu1 %v701_v22 }
 0x254   :  { %v440_v51 = vmax.f32 %v429_v49, 0.0  ;;  %1375 = vmatprep.subr.mxu1 %v700_v23 }
 0x255   :  { %v433_v52 = vpop.f32.mrf.mxu1  ;;  %1376 = vmatpush3.msra.mxu1 %v700_v23 }
 0x256   :  { %v434_v53 = vadd.f32 %v1127_v35, %v433_v52  ;;  %1337 = vmatmul.mubr.f32.gmra.mxu1 %v440_v51  ;;  %1377 = vmatprep.subr.mxu1 %v699_v24  ;;  %v815_v52 = vld [vmem:[#allocation6 + $0x288] sm:$0xf] }
 0x257   :  { %v1294_v54 = vpop.f32.mrf.mxu1  ;;  %1339 = vmatprep.mubr.msk.f32.mxu1 %vm1543_vm0, %v1542_v0  ;;  %1378 = vmatpush3.msra.mxu1 %v699_v24  ;;  %v1013_v24 = vld [vmem:[#allocation6 + $0x380] sm:$0x3f] }
 0x258   :  { %v441_v55 = vmax.f32 %v434_v53, 0.0  ;;  %1379 = vmatprep.subr.mxu1 %v698_v39  ;;  %v814_v53 = vld [vmem:[#allocation6 + $0x280] sm:$0xff]  ;;  %v915_v54 = vld [vmem:[#allocation6 + $0x378] sm:$0xff] }
 0x259   :  { %1380 = vmatpush3.msra.mxu1 %v698_v39 }
 0x25a   :  { %1340 = vmatmul.mubr.f32.gmra.mxu1 %v441_v55  ;;  %1381 = vmatprep.subr.mxu1 %v697_v40  ;;  %v914_v55 = vld [vmem:[#allocation6 + $0x370] sm:$0xff] }
 0x25b   :  { %1382 = vmatpush3.msra.mxu1 %v697_v40 }
 0x25c   :  { %1383 = vmatprep.subr.mxu1 %v696_v41 }
 0x25d   :  { %1384 = vmatpush3.msra.mxu1 %v696_v41 }
 0x25e   :  { %1385 = vmatprep.subr.mxu1 %v695_v42 }
 0x25f   :  { %1386 = vmatpush3.msra.mxu1 %v695_v42 }
 0x260   :  { %1390 = vmatprep.subr.mxu1 %v1542_v0 }
 0x300   :  { %v525_v58 = vpop.f32.mrf.mxu1 }
 0x301   :  { %550 = vst [vmem:[#allocation2 + $0x1] sm:$0xff] %v525_v58 }
 0x302   :  { %v1329_v59 = vpop.f32.mrf.mxu1 }
 0x308   :  { %v530_v60 = vpop.f32.mrf.mxu1 }
 0x309   :  { %551 = vst [vmem:[#allocation2 + $0x9] sm:$0xff] %v530_v60  ;;  %v912_v60 = vld [vmem:[#allocation6 + $0x360] sm:$0xff] }
 0x30a   :  { %v1332_v61 = vpop.f32.mrf.mxu1 }
 0x30b   :  { %v911_v61 = vld [vmem:[#allocation6 + $0x358] sm:$0xff] }
 0x30e   :  { %v535_v63 = vpop.f32.mrf.mxu1 }
 0x30f   :  { %552 = vst [vmem:[#allocation2 + $0x11] sm:$0x3] %v535_v63  ;;  %555 = vst [vmem:[#allocation2 + $0x13] sm:$0xf8] %v535_v63  ;;  %v909_v63 = vld [vmem:[#allocation6 + $0x348] sm:$0xff] }
 0x310   :  { %v1335_v1 = vpop.f32.mrf.mxu1 }
 0x311   :  { %v908_v1 = vld [vmem:[#allocation6 + $0x340] sm:$0xff] }
 0x316   :  { %v540_v3 = vpop.f32.mrf.mxu1  ;;  %v562_v4 = vld [vmem:[#allocation2 + $0x1] ss:$3 sm:$0xff]  ;;  %v575_v5 = vld [vmem:[#allocation2 + $0x2] ss:$3 sm:$0xff]  ;;  %v559_v6 = vld [vmem:[#allocation2] ss:$3 sm:$0xff] }
 0x317   :  { %556 = vst [vmem:[#allocation2 + $0x1b] sm:$0xff] %v540_v3  ;;  %567 = vrot.lane.b32.xlu0 %v562_v4, %s1545_s2  ;;  %788 = vst [vmem:[#allocation2 + $0x7] sm:$0x3] %v1542_v0  ;;  %v906_v3 = vld [vmem:[#allocation6 + $0x330] sm:$0xff]  ;;  %v905_v4 = vld [vmem:[#allocation6 + $0x328] sm:$0xff] }
 0x318   :  { %792 = vst [vmem:[#allocation2 + $0x10] sm:$0x3] %v1542_v0  ;;  %789 = vst [vmem:[#allocation2 + $0x9] sm:$0x1] %v1542_v0  ;;  %v1338_v8 = vpop.f32.mrf.mxu1 }
 0x319   :  { %786 = vst [vmem:[#allocation2] sm:$0x1] %v1542_v0 }
 0x31a   :  { %v545_v9 = vpop.f32.mrf.mxu1 }
 0x31b   :  { %557 = vst [vmem:[#allocation2 + $0x23] sm:$0x1f] %v545_v9  ;;  %580 = vrot.lane.b32.xlu0 %v575_v5, %s1546_s28  ;;  %v904_v5 = vld [vmem:[#allocation6 + $0x320] sm:$0xff] }
 0x31c   :  { %v1341_v10 = vpop.f32.mrf.mxu1 }
 0x31d   :  { %v1139_v10 = vld [vmem:[#allocation8 + $0x4] ss:$0 sm:$0xff] }
 0x322   :  { %v564_v13 = vld [vmem:[#allocation2 + $0x19] ss:$3 sm:$0x1f]  ;;  %v577_v16 = vld [vmem:[#allocation2 + $0x1a] ss:$3 sm:$0x1f] }
 0x323   :  { %569 = vrot.lane.b32.xlu1 %v564_v13, %s1545_s2  ;;  %v561_v33 = vld [vmem:[#allocation2 + $0x18] ss:$3 sm:$0x1f] }
 0x327   :  { %582 = vrot.lane.b32.xlu1 %v577_v16, %s1546_s28  ;;  %v900_v16 = vld [vmem:[#allocation6 + $0x300] sm:$0xff] }
 0x389   :  { %v568_v25 = vpop.permute.xlu0 %567 }
 0x38a   :  { %v573_v26 = vadd.f32 %v568_v25, %v559_v6  ;;  %v903_v6 = vld [vmem:[#allocation6 + $0x318] sm:$0xff] }
 0x38d   :  { %v581_v28 = vpop.permute.xlu0 %580 }
 0x38e   :  { %v586_v29 = vadd.f32 %v581_v28, %v573_v26 }
 0x390   :  { %v593_v30 = vadd.f32 %v1134_v27, %v586_v29 }
 0x392   :  { %v595_v31 = vmax.f32 %v593_v30, 0.0  ;;  %v1143_v30 = vld [vmem:[#allocation8 + $0x6] ss:$0 sm:$0xff] }
 0x394   :  { %1352 = vmatprep.mubr.msk.f32.mxu0 %vm68_vm2, %v595_v31 }
 0x395   :  { %v570_v32 = vpop.permute.xlu1 %569 }
 0x396   :  { %v574_v34 = vadd.f32 %v570_v32, %v561_v33 }
 0x399   :  { %v583_v35 = vpop.permute.xlu1 %582 }
 0x39a   :  { %v587_v36 = vadd.f32 %v583_v35, %v574_v34  ;;  %v1144_v34 = vld [vmem:[#allocation8 + $0x7] ss:$0 sm:$0xff] }
 0x39c   :  { %v594_v37 = vadd.f32 %v1134_v27, %v587_v36 }
 0x39e   :  { %v596_v38 = vmax.f32 %v594_v37, 0.0 }
 0x3a0   :  { %1353 = vmatmul.mubr.msk.f32.vlgmr.msra.gmra.mxu0 %vm68_vm2, %v596_v38 }
 0x3a1   :  { %1429 = vmatprep.mubr.msk.f32.mxu0 %vm1543_vm0, %v1542_v0  ;;  %1398 = vmatpush3.msra.mxu0 %v915_v54 }
 0x3a2   :  { %1399 = vmatprep.subr.mxu0 %v1542_v0 }
 0x3a3   :  { %1400 = vmatpush3.msra.mxu0 %v914_v55 }
 0x3a4   :  { %1401 = vmatprep.subr.mxu0 %v1542_v0 }
 0x3a5   :  { %1402 = vmatpush3.msra.mxu0 %v913_v56 }
 0x3a6   :  { %1403 = vmatprep.subr.mxu0 %v1542_v0 }
 0x3a7   :  { %1404 = vmatpush3.msra.mxu0 %v912_v60 }
 0x3a8   :  { %1405 = vmatprep.subr.mxu0 %v1542_v0 }
 0x3a9   :  { %1406 = vmatpush3.msra.mxu0 %v911_v61 }
 0x3aa   :  { %1407 = vmatprep.subr.mxu0 %v1542_v0 }
 0x3ab   :  { %1408 = vmatpush3.msra.mxu0 %v910_v62 }
 0x3ac   :  { %1409 = vmatprep.subr.mxu0 %v1542_v0 }
 0x3ad   :  { %1410 = vmatpush3.msra.mxu0 %v909_v63 }
 0x3ae   :  { %1411 = vmatprep.subr.mxu0 %v1542_v0 }
 0x3af   :  { %1412 = vmatpush3.msra.mxu0 %v908_v1 }
 0x3b0   :  { %1413 = vmatprep.subr.mxu0 %v1542_v0 }
 0x3b1   :  { %1414 = vmatpush3.msra.mxu0 %v907_v2 }
 0x3b2   :  { %1415 = vmatprep.subr.mxu0 %v1542_v0 }
 0x3b3   :  { %1416 = vmatpush3.msra.mxu0 %v906_v3 }
 0x3b4   :  { %1417 = vmatprep.subr.mxu0 %v1542_v0 }
 0x3b5   :  { %1418 = vmatpush3.msra.mxu0 %v905_v4 }
 0x3b6   :  { %1419 = vmatprep.subr.mxu0 %v1542_v0 }
 0x3b7   :  { %1420 = vmatpush3.msra.mxu0 %v904_v5 }
 0x3b8   :  { %1421 = vmatprep.subr.mxu0 %v1542_v0 }
 0x3b9   :  { %1422 = vmatpush3.msra.mxu0 %v903_v6 }
 0x3ba   :  { %1423 = vmatprep.subr.mxu0 %v1542_v0 }
 0x3bb   :  { %1424 = vmatpush3.msra.mxu0 %v902_v14 }
 0x3bc   :  { %1425 = vmatprep.subr.mxu0 %v1542_v0 }
 0x3bd   :  { %1426 = vmatpush3.msra.mxu0 %v901_v15 }
 0x3be   :  { %1427 = vmatprep.subr.mxu0 %v1542_v0 }
 0x3bf   :  { %1428 = vmatpush3.msra.mxu0 %v900_v16 }
 0x460   :  { %v1354_v44 = vpop.f32.mrf.mxu0 }
 0x461   :  { %v689_v45 = vadd.f32 %v1354_v44, %v1135_v43 }
 0x462   :  { %v683_v46 = vpop.f32.mrf.mxu0 }
 0x463   :  { %v684_v47 = vadd.f32 %v1135_v43, %v683_v46  ;;  %v693_v49 = vmax.f32 %v689_v45, 0.0 }
 0x465   :  { %v692_v48 = vmax.f32 %v684_v47, 0.0 }
 0x467   :  { %1387 = vmatprep.mubr.f32.mxu1 %v692_v48 }
 0x468   :  { %1388 = vmatmul.mubr.f32.vlgmr.msra.gmra.mxu1 %v693_v49 }
 0x469   :  { %1394 = vmatprep.mubr.msk.f32.mxu1 %vm1543_vm0, %v1542_v0  ;;  %1391 = vmatpush3.msk.msra.mxu1 %vm96_vm1, %v815_v52 }
 0x46a   :  { %1392 = vmatprep.subr.mxu1 %v1542_v0 }
 0x46b   :  { %1393 = vmatpush3.msra.mxu1 %v814_v53 }
 0x46c   :  { %1432 = vmatprep.subr.mxu1 %v1542_v0 }
 0x528   :  { %v1389_v50 = vpop.f32.mrf.mxu1 }
 0x529   :  { %791 = vst [vmem:[#allocation2 + $0xb] sm:$0x1f] %v1389_v50 }
 0x52a   :  { %v777_v51 = vpop.f32.mrf.mxu1 }
 0x52b   :  { %787 = vst [vmem:[#allocation2 + $0x1] sm:$0x3f] %v777_v51  ;;  %790 = vst [vmem:[#allocation2 + $0x3] sm:$0x80] %v777_v51 }
 0x532   :  { %v800_v57 = vld [vmem:[#allocation2 + $0x2] ss:$3 sm:$0x1f]  ;;  %v794_v58 = vld [vmem:[#allocation2 + $0x1] ss:$3 sm:$0x1f] }
 0x533   :  { %802 = vrot.lane.b32.xlu1 %v800_v57, %s1547_s29  ;;  %796 = vrot.lane.b32.xlu0 %v794_v58, %s1548_s30  ;;  %989 = vst [vmem:[#allocation2 + $0x4] sm:$0x1] %v1542_v0  ;;  %991 = vst [vmem:[#allocation2 + $0x7] sm:$0x1] %v1542_v0 }
 0x534   :  { %v793_v59 = vld [vmem:[#allocation2] ss:$3 sm:$0x1f] }
 0x535   :  { %986 = vst [vmem:[#allocation2] sm:$0x1] %v1542_v0  ;;  %988 = vst [vmem:[#allocation2 + $0x3] sm:$0x1] %v1542_v0 }
 0x5a5   :  { %v797_v7 = vpop.permute.xlu0 %796  ;;  %v803_v9 = vpop.permute.xlu1 %802 }
 0x5a6   :  { %v799_v8 = vadd.f32 %v797_v7, %v793_v59 }
 0x5a8   :  { %v805_v11 = vadd.f32 %v803_v9, %v799_v8 }
 0x5aa   :  { %v811_v12 = vadd.f32 %v1139_v10, %v805_v11 }
 0x5ac   :  { %v812_v13 = vmax.f32 %v811_v12, 0.0 }
 0x5ae   :  { %1395 = vmatmul.mubr.msk.f32.vlgmr.msra.gmra.mxu1 %vm821_vm5, %v812_v13 }
 0x5af   :  { %1434 = vmatprep.mubr.msk.f32.mxu1 %vm1543_vm0, %v1542_v0  ;;  %1433 = vmatpush3.msk.msra.mxu1 %vm1023_vm6, %v1013_v24 }
 0x66e   :  { %v894_v18 = vpop.f32.mrf.mxu1 }
 0x66f   :  { %v895_v19 = vadd.f32 %v1140_v17, %v894_v18 }
 0x670   :  { %v1396_v20 = vpop.f32.mrf.mxu1 }
 0x671   :  { %v898_v21 = vmax.f32 %v895_v19, 0.0 }
 0x673   :  { %1430 = vmatmul.mubr.f32.vlgmr.msra.gmra.mxu0 %v898_v21 }
 0x733   :  { %v982_v22 = vpop.f32.mrf.mxu0 }
 0x734   :  { %987 = vst [vmem:[#allocation2 + $0x1] sm:$0x3] %v982_v22  ;;  %990 = vst [vmem:[#allocation2 + $0x2] sm:$0x18] %v982_v22 }
 0x735   :  { %v1431_v23 = vpop.f32.mrf.mxu0 }
 0x73b   :  { %v999_v25 = vld [vmem:[#allocation2 + $0x2] ss:$2 sm:$0x7]  ;;  %v993_v26 = vld [vmem:[#allocation2 + $0x1] ss:$2 sm:$0x7] }
 0x73c   :  { %1001 = vrot.lane.b32.xlu1 %v999_v25, %s1548_s30  ;;  %995 = vrot.lane.b32.xlu0 %v993_v26, %s1549_s4  ;;  %v992_v27 = vld [vmem:[#allocation2] ss:$2 sm:$0x7] }
 0x7ae   :  { %v996_v0 = vpop.permute.xlu0 %995  ;;  %v1002_v29 = vpop.permute.xlu1 %1001 }
 0x7af   :  { %v998_v28 = vadd.f32 %v996_v0, %v992_v27 }
 0x7b1   :  { %v1004_v31 = vadd.f32 %v1002_v29, %v998_v28 }
 0x7b3   :  { %v1010_v32 = vadd.f32 %v1143_v30, %v1004_v31 }
 0x7b5   :  { %v1011_v33 = vmax.f32 %v1010_v32, 0.0 }
 0x7b7   :  { %1435 = vmatmul.mubr.msk.f32.vlgmr.msra.gmra.mxu1 %vm1019_vm7, %v1011_v33 }
 0x877   :  { %v1093_v35 = vpop.f32.mrf.mxu1 }
 0x878   :  { %v1094_v36 = vadd.f32 %v1144_v34, %v1093_v35 }
 0x879   :  { %v1436_v37 = vpop.f32.mrf.mxu1 }
 0x87a   :  { %v1097_v38 = vmax.f32 %v1094_v36, 0.0 }
 0x87c   :  { %1098 = vst [vmem:[#allocation9] sm:$0x1] %v1097_v38  ;;  %1099 = vst [vmem:[#allocation9 - $0x1] sm:$0x4] %v1097_v38 }
 0x87d   :  { %1522 = shalt.err (!%p1519_p5)
}
 0x87e   :  { %1109 = dma.vmem_to_hbm [thread:$0]  %s1107_s6, 32, %s1729_s3, [#allocation5]  }
 0x87f   :  { %1535 = dma.done.wait [#allocation5], 32  }
 0x880   :  { %1536 = vsyncadd [#allocation5], 4294967264 }
 0x881   :  { %1113 = vsyncpa [#allocation4], 1 }
 0x882   :  { %1114 = vsyncpa [#allocation7], 1 }
 0x883   :  { %1115 = vsyncpa [#allocation5], 1 }

</bundles_post_ra>
